<compile_context>
chip_gen: v7x
topology: tpu7x:2x2x1
jax: 0.10.0
libtpu: 0.0.40
codegen_flags: <defaults>
</compile_context>

<pallas_src>
import jax
import jax.numpy as jnp
from jax.experimental import pallas as pl
from jax.experimental.pallas import tpu as pltpu

_MIB = 1024 * 1024


def _round_up(x, m):
    return ((x + m - 1) // m) * m


def _cdiv(a, b):
    return (a + b - 1) // b


def _vmem_capacity_bytes():
    """Physical VMEM of the local chip; conservative fallback if unqueryable."""
    try:
        cap = int(pltpu.get_tpu_info().vmem_capacity_bytes)
        if cap > 0:
            return cap
    except Exception:
        pass
    return 64 * _MIB  # v7x per-TC figure: safe lower bound everywhere


def _trainable_relu_kernel(gate_ref, x_ref, o_ref):
    # gate_ref: (TM, 1) float gate in {0, 1} (1 -> apply ReLU to this row)
    # x_ref / o_ref: (TM, cols)
    x = x_ref[...]
    g = gate_ref[...] > 0.5
    o_ref[...] = jnp.where(g, jnp.maximum(x, jnp.zeros_like(x)), x)


def trainable_relu(x, mask_param, threshold=0.5):
    """x: (N, C, H, W), mask_param: (C,) raw (pre-sigmoid) parameter."""
    N, C, H, W = x.shape
    rows, cols = N * C, H * W
    itemsize = jnp.dtype(x.dtype).itemsize

    # Dtype-aware sublane alignment (sub-32-bit dtypes pack along sublanes).
    row_align = 8 * max(1, 4 // itemsize)          # 8 f32 / 16 bf16 / 32 int8

    # Generation-aware block-size target and scoped-VMEM ceiling.
    vmem_cap = _vmem_capacity_bytes()
    if vmem_cap >= 96 * _MIB:                      # v5e / v6e: 128 MiB VMEM
        target_block_bytes, vmem_cap_limit = 12 * _MIB, 96 * _MIB
    else:                                          # v7x: 64 MiB VMEM per TC
        target_block_bytes, vmem_cap_limit = 8 * _MIB, 48 * _MIB

    # Full-width row blocks: TM rows x cols lanes; TM a multiple of row_align,
    # or TM == rows (full dim, exempt from the sublane-divisibility rule).
    # For any realistic VGG feature map, row_align full-width rows stay well
    # under the VMEM budget, so no lane tiling is ever needed.
    row_bytes = cols * itemsize
    tm = max(row_align,
             (target_block_bytes // max(row_bytes, 1)) // row_align * row_align)
    if tm >= rows:
        tm = rows                                  # single full-height block
    nblk = _cdiv(rows, tm)

    # Prefer an even block count so v7x's two TensorCores stay balanced.
    if nblk % 2 == 1:
        if nblk > 1:
            tm2 = _round_up(_cdiv(rows, nblk + 1), row_align)
            if row_align <= tm2 < rows and _cdiv(rows, tm2) % 2 == 0:
                tm, nblk = tm2, _cdiv(rows, tm2)
        elif vmem_cap < 96 * _MIB and rows > row_align:
            tm2 = _round_up(_cdiv(rows, 2), row_align)
            if row_align <= tm2 < rows:
                tm, nblk = tm2, _cdiv(rows, tm2)

    block_bytes = tm * cols * itemsize
    # Double-buffered x-in + out (+ tiny gate buffers); 6x gives headroom.
    vmem_limit = int(min(vmem_cap_limit, max(32 * _MIB, 6 * block_bytes)))

    # Hoist the C-sized gate computation out of the kernel (one value per row).
    gate = (jax.nn.sigmoid(mask_param) >= threshold).astype(x.dtype)        # (C,)
    gate_rows = jnp.broadcast_to(gate[None, :], (N, C)).reshape(rows, 1)    # (rows, 1)

    x2 = x.reshape(rows, cols)   # contiguous metadata-only reshape (no copy)

    cost = pl.CostEstimate(
        flops=rows * cols,       # one max/select per element
        transcendentals=0,
        bytes_accessed=2 * rows * cols * itemsize + rows * itemsize,
    )

    out2 = pl.pallas_call(
        _trainable_relu_kernel,
        out_shape=jax.ShapeDtypeStruct((rows, cols), x.dtype),
        grid_spec=pltpu.PrefetchScalarGridSpec(
            num_scalar_prefetch=0,
            grid=(nblk,),
            in_specs=[
                pl.BlockSpec((tm, 1), lambda i: (i, 0)),      # per-row gate
                pl.BlockSpec((tm, cols), lambda i: (i, 0)),   # x row block
            ],
            out_specs=pl.BlockSpec((tm, cols), lambda i: (i, 0)),
        ),
        compiler_params=pltpu.CompilerParams(
            dimension_semantics=("parallel",),
            vmem_limit_bytes=vmem_limit,
        ),
        cost_estimate=cost,
    )(gate_rows, x2)

    return out2.reshape(N, C, H, W)


if __name__ == "__main__":
    key = jax.random.PRNGKey(0)
    k_mask, k_x = jax.random.split(key)

    N, C, H, W = 2, 4, 16, 16
    threshold = 0.5

    # Matches torch init: (-1 - 1) * rand(C) + 1  -> uniform in (-1, 1]
    mask_param = jax.random.uniform(
        k_mask, (C,), dtype=jnp.float32, minval=-1.0, maxval=1.0
    )
    x = jax.random.normal(k_x, (N, C, H, W), dtype=jnp.float32)

    out = trainable_relu(x, mask_param, threshold)
    out = jax.block_until_ready(out)

    # Reference check in plain JAX (same semantics as the PyTorch module).
    relu_idx = jax.nn.sigmoid(mask_param) >= threshold          # (C,)
    ref = jnp.where(relu_idx[None, :, None, None], jnp.maximum(x, 0.0), x)
    assert jnp.allclose(out, ref, atol=1e-6), "mismatch vs reference"

    print("KERNEL_OK")
</pallas_src>

<mosaic_0001>
module attributes {stable_mosaic.version = 11 : i64} {
  func.func @_trainable_relu_kernel(%arg0: i32, %arg1: memref<8x1xf32, #tpu.memory_space<vmem>>, %arg2: memref<8x256xf32, #tpu.memory_space<vmem>>, %arg3: memref<8x256xf32, #tpu.memory_space<vmem>>) attributes {dimension_semantics = [#tpu.dimension_semantics<parallel>], iteration_bounds = array<i64: 1>, scalar_prefetch = 0 : i64, scratch_operands = 0 : i64, tpu.core_type = #tpu.core_type<tc>, window_params = [{transform_indices = @transform_0, window_bounds = array<i64: 8, 1>}, {transform_indices = @transform_1, window_bounds = array<i64: 8, 256>}, {transform_indices = @transform_2, window_bounds = array<i64: 8, 256>}]} {
    %c0 = arith.constant 0 : index
    %c0_0 = arith.constant 0 : index
    %0 = vector.load %arg2[%c0, %c0_0] : memref<8x256xf32, #tpu.memory_space<vmem>>, vector<8x256xf32>
    %c0_1 = arith.constant 0 : index
    %c0_2 = arith.constant 0 : index
    %1 = vector.load %arg1[%c0_1, %c0_2] : memref<8x1xf32, #tpu.memory_space<vmem>>, vector<8x1xf32>
    %cst = arith.constant 5.000000e-01 : f32
    %2 = vector.broadcast %cst : f32 to vector<8x1xf32>
    %3 = arith.cmpf ogt, %1, %2 : vector<8x1xf32>
    %cst_3 = arith.constant 0.000000e+00 : f32
    %4 = vector.broadcast %cst_3 : f32 to vector<8x256xf32>
    %5 = arith.maximumf %0, %4 : vector<8x256xf32>
    %6 = vector.shape_cast %3 : vector<8x1xi1> to vector<8x1xi1>
    %7 = vector.broadcast %6 : vector<8x1xi1> to vector<8x256xi1>
    %8 = arith.select %7, %5, %0 : vector<8x256xi1>, vector<8x256xf32>
    %c0_4 = arith.constant 0 : index
    %c0_5 = arith.constant 0 : index
    %9 = vector.load %arg3[%c0_4, %c0_5] : memref<8x256xf32, #tpu.memory_space<vmem>>, vector<8x256xf32>
    tpu.vector_store %arg3[%c0_4, %c0_5], %8 {strides = array<i32>} : memref<8x256xf32, #tpu.memory_space<vmem>>, vector<8x256xf32>,
    return
  }
  func.func @transform_0(%arg0: i32) -> (i32, i32) {
    %c0_i32 = arith.constant 0 : i32
    %c0_i32_0 = arith.constant 0 : i32
    return %arg0, %c0_i32 : i32, i32
  }
  func.func @transform_1(%arg0: i32) -> (i32, i32) {
    %c0_i32 = arith.constant 0 : i32
    %c0_i32_0 = arith.constant 0 : i32
    return %arg0, %c0_i32 : i32, i32
  }
  func.func @transform_2(%arg0: i32) -> (i32, i32) {
    %c0_i32 = arith.constant 0 : i32
    %c0_i32_0 = arith.constant 0 : i32
    return %arg0, %c0_i32 : i32, i32
  }
}

</mosaic_0001>

<bundles_post_ra>
// kernel: tpu_custom_call.1
= control target key start
LH: loop header
LB: loop body
LE: loop exit
PB: predicated region body
PF: predicated region fallthrough
CT: control target
= control target key end

     0   :  { %7 = vsyncpa [#allocation3], 0  ;;  %s151_s0 = inlined_call_operand.vmem [shape: f32[8,1], index: 0, kind: input, shape index: {}]   ;;  %s152_s1 = inlined_call_operand.hbm [shape: f32[8,256], index: 1, kind: input, shape index: {}]   ;;  %s153_s2 = inlined_call_operand.hbm [shape: f32[8,256], index: 2, kind: output, shape index: {}]  }
   0x1   :  { %8 = vsyncpa [#allocation4], 0  ;;  %s106_s9 = smov [#allocation2]   ;;  %s58_s13 = scalar_lea.hbm %s152_s1, 256 }
   0x2   :  { %s17_s10 = sshll.u32 %s106_s9, 4  ;;  %p59_p0 = scmp.ne.s32.totalorder %s152_s1, %s58_s13  ;;  %s18_s10 = int_to_ptr.vmem [resolvable:$true] %s17_s10 }
   0x3   :  { %p62_p1 = scmp.lt.u32.totalorder %s58_s13, %s152_s1 }
   0x5   :  { %p64_p2 = pnand %p62_p1, %p59_p0 }
   0x7   :  { %67 = shalt.err (!%p64_p2)
}
   0x8   :  { %s68_s18 = scalar_lea.vmem %s18_s10, 256  ;;  %p73_p4 = scmp.lt.s32.totalorder %s18_s10, %s18_s10 }
   0x9   :  { %p69_p3 = scmp.ne.s32.totalorder %s18_s10, %s68_s18  ;;  %p74_p5 = scmp.lt.s32.totalorder %s68_s18, %s68_s18 }
   0xb   :  { %p75_p6 = por %p74_p5, %p73_p4 }
   0xd   :  { %p76_p7 = pnand %p75_p6, %p69_p3 }
   0xf   :  { %79 = shalt.err (!%p76_p7)
}
  0x10   :  { %20 = dma.hbm_to_vmem [thread:$0]  %s152_s1, 256, %s18_s10, [#allocation3]  }
  0x11   :  { %102 = dma.done.wait [#allocation3], 256  }
  0x12   :  { %103 = vsyncadd [#allocation3], 4294967040  ;;  %v107_v0 = vmov 0   ;;  %v26_v1 = vld [vmem:[%s151_s0] sm:$0xff]  ;;  %v25_v4 = vld [vmem:[#allocation2 + $0x8] sm:$0xff]  ;;  %s108_s23 = smov [#allocation5]  }
  0x13   :  { %57 = vset.pattern.permute.xlu0 %v107_v0  ;;  %vm27_vm0 = vcmp.gt.f32.partialorder %v26_v1, 0.5  ;;  %v24_v3 = vld [vmem:[#allocation2] sm:$0xff]  ;;  %v29_v6 = vmax.f32 %v25_v4, 0.0  ;;  %s45_s24 = sshll.u32 %s108_s23, 4  ;;  %s46_s24 = int_to_ptr.vmem [resolvable:$true] %s45_s24 }
  0x14   :  { %v30_v2 = vsel %vm27_vm0, 1, %v107_v0  ;;  %v28_v5 = vmax.f32 %v24_v3, 0.0  ;;  %s80_s1 = scalar_lea.vmem %s46_s24, 256  ;;  %p85_p9 = scmp.lt.s32.totalorder %s46_s24, %s46_s24 }
  0x15   :  { %32 = vperm.xlu0 %57, %v30_v2   ;;  %p81_p8 = scmp.ne.s32.totalorder %s46_s24, %s80_s1  ;;  %p86_p10 = scmp.lt.s32.totalorder %s80_s1, %s80_s1 }
  0x17   :  { %p87_p11 = por %p86_p10, %p85_p9 }
  0x19   :  { %p88_p12 = pnand %p87_p11, %p81_p8 }
  0x94   :  { %v33_v7 = vpop.permute.xlu0 %32 }
  0x95   :  { %vm34_vm1 = vcmp.eq.s32.totalorder %v33_v7, 1 }
  0x96   :  { %v35_v8 = vsel %vm34_vm1, %v28_v5, %v24_v3  ;;  %v36_v9 = vsel %vm34_vm1, %v29_v6, %v25_v4 }
  0x97   :  { %37 = vst [vmem:[#allocation5] sm:$0xff] %v35_v8  ;;  %38 = vst [vmem:[#allocation5 + $0x8] sm:$0xff] %v36_v9 }
  0x98   :  { %91 = shalt.err (!%p88_p12)
}
  0x99   :  { %s92_s26 = scalar_lea.hbm %s153_s2, 256 }
  0x9a   :  { %p93_p13 = scmp.ne.s32.totalorder %s153_s2, %s92_s26  ;;  %p96_p0 = scmp.lt.u32.totalorder %s92_s26, %s153_s2 }
  0x9c   :  { %p98_p1 = pnand %p96_p0, %p93_p13 }
  0x9e   :  { %101 = shalt.err (!%p98_p1)
}
  0x9f   :  { %48 = dma.vmem_to_hbm [thread:$0]  %s46_s24, 256, %s153_s2, [#allocation4]  }
  0xa0   :  { %104 = dma.done.wait [#allocation4], 256  }
  0xa1   :  { %105 = vsyncadd [#allocation4], 4294967040 }
  0xa2   :  { %52 = vsyncpa [#allocation3], 1 }
  0xa3   :  { %53 = vsyncpa [#allocation4], 1 }

</bundles_post_ra>
